<compile_context>
chip_gen: v6e
topology: v6e:2x2x1
jax: 0.10.0
libtpu: 0.0.40
codegen_flags: <defaults>
</compile_context>

<pallas_src>
import math

import jax
import jax.numpy as jnp
from jax.experimental import pallas as pl
from jax.experimental.pallas import tpu as pltpu


def _vmem_capacity_bytes() -> int:
    """Generation-specific VMEM capacity, with a conservative fallback."""
    try:
        info = pltpu.get_tpu_info()
        cap = getattr(info, "vmem_capacity_bytes", None)
        if cap:
            return int(cap)
    except Exception:
        pass
    return 64 * 1024 * 1024  # v7x per-TensorCore VMEM (smallest of v5e/v6e/v7x)


def _select_tiles(n: int, d: int, itemsize: int, vmem_cap: int):
    """Pick (row_tile TB, col_tile DK, sublane multiple).

    Prefers full-D row tiles (DK == d).  Falls back to D-chunking (DK a
    multiple of 128) only when a minimal row tile of full-D rows would not
    fit the VMEM budget."""
    sub = max(8, 32 // itemsize)          # sublane multiple for packed dtypes
    budget = vmem_cap // 4                # headroom for scratch/compiler
    n_pad = -(-n // sub) * sub
    per_row_bytes = 2 * 2 * d * itemsize  # 2 inputs x 2 pipeline buffers
    if sub * per_row_bytes <= budget:
        tb = (budget // per_row_bytes) // sub * sub
        tb = max(sub, min(2048, tb, n_pad))
        dk = d                            # no D tiling needed
    else:
        tb = sub
        dk = max(128, (budget // (2 * 2 * sub * itemsize)) // 128 * 128)
    return tb, dk, sub


def _make_snr_kernel(tao: float, eps: float):
    def snr_loss_kernel(x_ref, s_ref, out_ref, ssd_ref, sss_ref, loss_ref):
        ii = pl.program_id(1)                 # row-tile (sequential) axis
        ki = pl.program_id(2)                 # D-chunk (sequential) axis
        last_ii = pl.num_programs(1) - 1
        last_ki = pl.num_programs(2) - 1

        @pl.when(jnp.logical_and(ii == 0, ki == 0))
        def _():
            loss_ref[...] = jnp.zeros_like(loss_ref)

        @pl.when(ki == 0)
        def _():
            ssd_ref[...] = jnp.zeros_like(ssd_ref)
            sss_ref[...] = jnp.zeros_like(sss_ref)

        x = x_ref[...].astype(jnp.float32)
        s = s_ref[...].astype(jnp.float32)

        diff = s - x
        ssd_ref[...] += jnp.sum(diff * diff, axis=-1, keepdims=True)  # (TB, 1)
        sss_ref[...] += jnp.sum(s * s, axis=-1, keepdims=True)        # (TB, 1)

        @pl.when(ki == last_ki)
        def _():
            # Single transcendental per row:
            # 10*log10(num) - 10*log10(den) == 10*log10(num/den).
            num = ssd_ref[...] + tao * sss_ref[...] + eps
            den = sss_ref[...] + eps
            loss_ref[...] += 10.0 * jnp.log10(num / den)              # VPU add

        @pl.when(jnp.logical_and(ii == last_ii, ki == last_ki))
        def _():
            # Collapse the per-row running sums once per super-block and
            # broadcast into the lane/sublane-aligned (1, 8, 128) output tile;
            # the wrapper reads element [p, 0, 0].
            out_ref[...] = jnp.zeros_like(out_ref) + jnp.sum(loss_ref[...])

    return snr_loss_kernel


def snr_loss(x, s, tao: float = 0.001, eps: float = 1e-8,
             max_rows_per_block=None, max_cols_per_block=None):
    if x.shape != s.shape:
        raise RuntimeError(
            "Dimention mismatch when calculate si-snr, {} vs {}".format(
                x.shape, s.shape))

    d = x.shape[-1]
    x2 = x.reshape(-1, d)
    s2 = s.reshape(-1, d)
    n = x2.shape[0]
    itemsize = jnp.dtype(x2.dtype).itemsize

    vmem_cap = _vmem_capacity_bytes()
    tb, dk, sub = _select_tiles(n, d, itemsize, vmem_cap)
    if max_rows_per_block is not None:   # test/tuning hook
        tb = max(sub, min(tb, (int(max_rows_per_block) // sub) * sub))
    if max_cols_per_block is not None:   # test/tuning hook
        dk = min(dk, max(128, (int(max_cols_per_block) // 128) * 128))

    if dk >= d:
        dk = d                           # single full-D chunk (no 128 constraint)
        d_pad = d
        n_k = 1
    else:
        d_pad = -(-d // dk) * dk         # zero-pad D so every chunk is full
        n_k = d_pad // dk

    n_tiles = -(-n // tb)
    p = 2 if n_tiles >= 2 else 1         # outer "parallel" super-blocks (v7x: 2 TCs)
    n_inner = -(-n_tiles // p)
    rows_padded = p * n_inner * tb

    row_pad = rows_padded - n
    col_pad = d_pad - d
    if row_pad or col_pad:
        # Zero rows/cols contribute exactly 0 to the loss sum.
        x2 = jnp.pad(x2, ((0, row_pad), (0, col_pad)))
        s2 = jnp.pad(s2, ((0, row_pad), (0, col_pad)))

    # Raise scoped VMEM to cover the double-buffered working set + scratch.
    working = (2 * 2 * tb * dk * itemsize        # inputs, double-buffered
               + 3 * tb * 128 * 4                # (TB,1) f32 accumulators (lane-padded)
               + p * 8 * 128 * 4                 # output tiles
               + (1 << 16))
    vmem_limit = int(min(vmem_cap, max(working + (8 << 20), 16 << 20)))

    kernel = _make_snr_kernel(float(tao), float(eps))

    partials = pl.pallas_call(
        kernel,
        out_shape=jax.ShapeDtypeStruct((p, 8, 128), jnp.float32),
        grid_spec=pltpu.PrefetchScalarGridSpec(
            num_scalar_prefetch=0,
            grid=(p, n_inner, n_k),
            in_specs=[
                pl.BlockSpec((tb, dk), lambda pi, ii, ki: (pi * n_inner + ii, ki)),
                pl.BlockSpec((tb, dk), lambda pi, ii, ki: (pi * n_inner + ii, ki)),
            ],
            out_specs=pl.BlockSpec((1, 8, 128), lambda pi, ii, ki: (pi, 0, 0)),
            scratch_shapes=[
                pltpu.VMEM((tb, 1), jnp.float32),   # sum((s-x)^2) per row
                pltpu.VMEM((tb, 1), jnp.float32),   # sum(s^2) per row
                pltpu.VMEM((tb, 1), jnp.float32),   # running per-row loss
            ],
        ),
        compiler_params=pltpu.CompilerParams(
            dimension_semantics=("parallel", "arbitrary", "arbitrary"),
            vmem_limit_bytes=vmem_limit,
        ),
    )(x2, s2)

    # Finish the mean over the true (un-padded) row count in the wrapper.
    return jnp.sum(partials[:, 0, 0]) / float(n)


def snr_loss_ref(x, s, tao: float = 0.001, eps: float = 1e-8):
    """Pure-JAX reference mirroring the PyTorch module."""
    l2_diff_sq = jnp.sum((s - x) ** 2, axis=-1)
    l2_s_sq = jnp.sum(s ** 2, axis=-1)
    loss = (10.0 * jnp.log10(l2_diff_sq + tao * l2_s_sq + eps)
            - 10.0 * jnp.log10(l2_s_sq + eps))
    return jnp.mean(loss)


if __name__ == "__main__":
    key = jax.random.PRNGKey(0)
    k1, k2, k3, k4, k5, k6, k7, k8 = jax.random.split(key, 8)

    # Case 1: aligned shapes (batch=8, seq=256), f32.
    x1 = jax.random.normal(k1, (8, 256), dtype=jnp.float32)
    s1 = x1 + 0.1 * jax.random.normal(k2, (8, 256), dtype=jnp.float32)
    o1 = jax.block_until_ready(snr_loss(x1, s1))
    r1 = jax.block_until_ready(snr_loss_ref(x1, s1))
    assert math.isfinite(float(o1))
    assert abs(float(o1) - float(r1)) < 1e-3, (float(o1), float(r1))

    # Case 2: ragged shapes (N=2*9=18 rows, D=100) -> exercises row padding
    # and a non-128 lane extent (full-dim block).
    x2 = jax.random.normal(k3, (2, 9, 100), dtype=jnp.float32)
    s2 = x2 + 0.05 * jax.random.normal(k4, (2, 9, 100), dtype=jnp.float32)
    o2 = jax.block_until_ready(snr_loss(x2, s2))
    r2 = jax.block_until_ready(snr_loss_ref(x2, s2))
    assert math.isfinite(float(o2))
    assert abs(float(o2) - float(r2)) < 1e-3, (float(o2), float(r2))

    # Case 3: bf16 inputs streamed as bf16 (kernel upcasts in VMEM; 16-row
    # sublane-aligned tiles).
    xb = x1.astype(jnp.bfloat16)
    sb = s1.astype(jnp.bfloat16)
    o3 = jax.block_until_ready(snr_loss(xb, sb))
    r3 = jax.block_until_ready(
        snr_loss_ref(xb.astype(jnp.float32), sb.astype(jnp.float32)))
    assert math.isfinite(float(o3))
    assert abs(float(o3) - float(r3)) < 1e-2, (float(o3), float(r3))

    # Case 4: force small row tiles to exercise the (parallel, arbitrary)
    # multi-step row axis, per-super-block partial sums and accumulator re-init.
    x4 = jax.random.normal(k5, (48, 128), dtype=jnp.float32)
    s4 = x4 + 0.2 * jax.random.normal(k6, (48, 128), dtype=jnp.float32)
    o4 = jax.block_until_ready(snr_loss(x4, s4, max_rows_per_block=8))
    r4 = jax.block_until_ready(snr_loss_ref(x4, s4))
    assert math.isfinite(float(o4))
    assert abs(float(o4) - float(r4)) < 1e-3, (float(o4), float(r4))

    # Case 5: force D-chunking (dk=128 over D=400 -> padded to 512, 4 chunks)
    # combined with 2 parallel super-blocks; exercises the long-last-dim path.
    x5 = jax.random.normal(k7, (16, 400), dtype=jnp.float32)
    s5 = x5 + 0.3 * jax.random.normal(k8, (16, 400), dtype=jnp.float32)
    o5 = jax.block_until_ready(
        snr_loss(x5, s5, max_rows_per_block=8, max_cols_per_block=128))
    r5 = jax.block_until_ready(snr_loss_ref(x5, s5))
    assert math.isfinite(float(o5))
    assert abs(float(o5) - float(r5)) < 1e-3, (float(o5), float(r5))

    print("KERNEL_OK")
</pallas_src>

<mosaic_0001>
module attributes {stable_mosaic.version = 11 : i64} {
  func.func @snr_loss_kernel(%arg0: i32, %arg1: i32, %arg2: i32, %arg3: memref<8x256xf32, #tpu.memory_space<vmem>>, %arg4: memref<8x256xf32, #tpu.memory_space<vmem>>, %arg5: memref<1x8x128xf32, #tpu.memory_space<vmem>>, %arg6: memref<8x1xf32, #tpu.memory_space<vmem>>, %arg7: memref<8x1xf32, #tpu.memory_space<vmem>>, %arg8: memref<8x1xf32, #tpu.memory_space<vmem>>) attributes {dimension_semantics = [#tpu.dimension_semantics<parallel>, #tpu.dimension_semantics<arbitrary>, #tpu.dimension_semantics<arbitrary>], iteration_bounds = array<i64: 1, 1, 1>, scalar_prefetch = 0 : i64, scratch_operands = 3 : i64, tpu.core_type = #tpu.core_type<tc>, window_params = [{transform_indices = @transform_0, window_bounds = array<i64: 8, 256>}, {transform_indices = @transform_1, window_bounds = array<i64: 8, 256>}, {transform_indices = @transform_2, window_bounds = array<i64: 1, 8, 128>}]} {
    %c0_i32 = arith.constant 0 : i32
    %0 = arith.cmpi eq, %arg1, %c0_i32 : i32
    %c0_i32_0 = arith.constant 0 : i32
    %1 = arith.cmpi eq, %arg2, %c0_i32_0 : i32
    %2 = arith.andi %0, %1 : i1
    %3 = arith.extui %2 : i1 to i32
    %c0_i32_1 = arith.constant 0 : i32
    %4 = arith.cmpi ne, %3, %c0_i32_1 : i32
    scf.if %4 {
      %cst_21 = arith.constant 0.000000e+00 : f32
      %31 = vector.broadcast %cst_21 : f32 to vector<8x1xf32>
      %c0_22 = arith.constant 0 : index
      %c0_23 = arith.constant 0 : index
      %32 = vector.load %arg8[%c0_22, %c0_23] : memref<8x1xf32, #tpu.memory_space<vmem>>, vector<8x1xf32>
      tpu.vector_store %arg8[%c0_22, %c0_23], %31 {strides = array<i32>} : memref<8x1xf32, #tpu.memory_space<vmem>>, vector<8x1xf32>,
    } else {
    }
    %c0_i32_2 = arith.constant 0 : i32
    %5 = arith.cmpi eq, %arg2, %c0_i32_2 : i32
    %6 = arith.extui %5 : i1 to i32
    %c0_i32_3 = arith.constant 0 : i32
    %7 = arith.cmpi ne, %6, %c0_i32_3 : i32
    scf.if %7 {
      %cst_21 = arith.constant 0.000000e+00 : f32
      %31 = vector.broadcast %cst_21 : f32 to vector<8x1xf32>
      %c0_22 = arith.constant 0 : index
      %c0_23 = arith.constant 0 : index
      %32 = vector.load %arg6[%c0_22, %c0_23] : memref<8x1xf32, #tpu.memory_space<vmem>>, vector<8x1xf32>
      tpu.vector_store %arg6[%c0_22, %c0_23], %31 {strides = array<i32>} : memref<8x1xf32, #tpu.memory_space<vmem>>, vector<8x1xf32>,
      %cst_24 = arith.constant 0.000000e+00 : f32
      %33 = vector.broadcast %cst_24 : f32 to vector<8x1xf32>
      %c0_25 = arith.constant 0 : index
      %c0_26 = arith.constant 0 : index
      %34 = vector.load %arg7[%c0_25, %c0_26] : memref<8x1xf32, #tpu.memory_space<vmem>>, vector<8x1xf32>
      tpu.vector_store %arg7[%c0_25, %c0_26], %33 {strides = array<i32>} : memref<8x1xf32, #tpu.memory_space<vmem>>, vector<8x1xf32>,
    } else {
    }
    %c0 = arith.constant 0 : index
    %c0_4 = arith.constant 0 : index
    %8 = vector.load %arg3[%c0, %c0_4] : memref<8x256xf32, #tpu.memory_space<vmem>>, vector<8x256xf32>
    %c0_5 = arith.constant 0 : index
    %c0_6 = arith.constant 0 : index
    %9 = vector.load %arg4[%c0_5, %c0_6] : memref<8x256xf32, #tpu.memory_space<vmem>>, vector<8x256xf32>
    %10 = arith.subf %9, %8 : vector<8x256xf32>
    %c0_7 = arith.constant 0 : index
    %c0_8 = arith.constant 0 : index
    %11 = vector.load %arg6[%c0_7, %c0_8] : memref<8x1xf32, #tpu.memory_space<vmem>>, vector<8x1xf32>
    %12 = arith.mulf %10, %10 : vector<8x256xf32>
    %cst = arith.constant dense<0.000000e+00> : vector<8xf32>
    %13 = vector.multi_reduction <add>, %12, %cst [1] : vector<8x256xf32> to vector<8xf32>
    %14 = vector.shape_cast %13 : vector<8xf32> to vector<8x1xf32>
    %15 = arith.addf %11, %14 : vector<8x1xf32>
    %c0_9 = arith.constant 0 : index
    %c0_10 = arith.constant 0 : index
    %16 = vector.load %arg6[%c0_9, %c0_10] : memref<8x1xf32, #tpu.memory_space<vmem>>, vector<8x1xf32>
    tpu.vector_store %arg6[%c0_9, %c0_10], %15 {strides = array<i32>} : memref<8x1xf32, #tpu.memory_space<vmem>>, vector<8x1xf32>,
    %c0_11 = arith.constant 0 : index
    %c0_12 = arith.constant 0 : index
    %17 = vector.load %arg7[%c0_11, %c0_12] : memref<8x1xf32, #tpu.memory_space<vmem>>, vector<8x1xf32>
    %18 = arith.mulf %9, %9 : vector<8x256xf32>
    %cst_13 = arith.constant dense<0.000000e+00> : vector<8xf32>
    %19 = vector.multi_reduction <add>, %18, %cst_13 [1] : vector<8x256xf32> to vector<8xf32>
    %20 = vector.shape_cast %19 : vector<8xf32> to vector<8x1xf32>
    %21 = arith.addf %17, %20 : vector<8x1xf32>
    %c0_14 = arith.constant 0 : index
    %c0_15 = arith.constant 0 : index
    %22 = vector.load %arg7[%c0_14, %c0_15] : memref<8x1xf32, #tpu.memory_space<vmem>>, vector<8x1xf32>
    tpu.vector_store %arg7[%c0_14, %c0_15], %21 {strides = array<i32>} : memref<8x1xf32, #tpu.memory_space<vmem>>, vector<8x1xf32>,
    %c0_i32_16 = arith.constant 0 : i32
    %23 = arith.cmpi eq, %arg2, %c0_i32_16 : i32
    %24 = arith.extui %23 : i1 to i32
    %c0_i32_17 = arith.constant 0 : i32
    %25 = arith.cmpi ne, %24, %c0_i32_17 : i32
    scf.if %25 {
      %c0_21 = arith.constant 0 : index
      %c0_22 = arith.constant 0 : index
      %31 = vector.load %arg6[%c0_21, %c0_22] : memref<8x1xf32, #tpu.memory_space<vmem>>, vector<8x1xf32>
      %c0_23 = arith.constant 0 : index
      %c0_24 = arith.constant 0 : index
      %32 = vector.load %arg7[%c0_23, %c0_24] : memref<8x1xf32, #tpu.memory_space<vmem>>, vector<8x1xf32>
      %cst_25 = arith.constant 1.000000e-03 : f32
      %33 = vector.broadcast %cst_25 : f32 to vector<8x1xf32>
      %34 = arith.mulf %33, %32 : vector<8x1xf32>
      %35 = arith.addf %31, %34 : vector<8x1xf32>
      %cst_26 = arith.constant 9.99999993E-9 : f32
      %36 = vector.broadcast %cst_26 : f32 to vector<8x1xf32>
      %37 = arith.addf %35, %36 : vector<8x1xf32>
      %c0_27 = arith.constant 0 : index
      %c0_28 = arith.constant 0 : index
      %38 = vector.load %arg7[%c0_27, %c0_28] : memref<8x1xf32, #tpu.memory_space<vmem>>, vector<8x1xf32>
      %cst_29 = arith.constant 9.99999993E-9 : f32
      %39 = vector.broadcast %cst_29 : f32 to vector<8x1xf32>
      %40 = arith.addf %38, %39 : vector<8x1xf32>
      %c0_30 = arith.constant 0 : index
      %c0_31 = arith.constant 0 : index
      %41 = vector.load %arg8[%c0_30, %c0_31] : memref<8x1xf32, #tpu.memory_space<vmem>>, vector<8x1xf32>
      %42 = arith.divf %37, %40 : vector<8x1xf32>
      %43 = math.log %42 : vector<8x1xf32>
      %cst_32 = arith.constant 0.434294492 : f32
      %44 = vector.broadcast %cst_32 : f32 to vector<8x1xf32>
      %45 = arith.mulf %43, %44 : vector<8x1xf32>
      %cst_33 = arith.constant 1.000000e+01 : f32
      %46 = vector.broadcast %cst_33 : f32 to vector<8x1xf32>
      %47 = arith.mulf %46, %45 : vector<8x1xf32>
      %48 = arith.addf %41, %47 : vector<8x1xf32>
      %c0_34 = arith.constant 0 : index
      %c0_35 = arith.constant 0 : index
      %49 = vector.load %arg8[%c0_34, %c0_35] : memref<8x1xf32, #tpu.memory_space<vmem>>, vector<8x1xf32>
      tpu.vector_store %arg8[%c0_34, %c0_35], %48 {strides = array<i32>} : memref<8x1xf32, #tpu.memory_space<vmem>>, vector<8x1xf32>,
    } else {
    }
    %c0_i32_18 = arith.constant 0 : i32
    %26 = arith.cmpi eq, %arg1, %c0_i32_18 : i32
    %c0_i32_19 = arith.constant 0 : i32
    %27 = arith.cmpi eq, %arg2, %c0_i32_19 : i32
    %28 = arith.andi %26, %27 : i1
    %29 = arith.extui %28 : i1 to i32
    %c0_i32_20 = arith.constant 0 : i32
    %30 = arith.cmpi ne, %29, %c0_i32_20 : i32
    scf.if %30 {
      %cst_21 = arith.constant 0.000000e+00 : f32
      %31 = vector.broadcast %cst_21 : f32 to vector<1x8x128xf32>
      %c0_22 = arith.constant 0 : index
      %c0_23 = arith.constant 0 : index
      %32 = vector.load %arg8[%c0_22, %c0_23] : memref<8x1xf32, #tpu.memory_space<vmem>>, vector<8x1xf32>
      %33 = vector.shape_cast %32 : vector<8x1xf32> to vector<1x8x1xf32>
      %cst_24 = arith.constant dense<0.000000e+00> : vector<1xf32>
      %34 = vector.multi_reduction <add>, %33, %cst_24 [1, 2] : vector<1x8x1xf32> to vector<1xf32>
      %35 = vector.shape_cast %34 : vector<1xf32> to vector<1x1x1xf32>
      %36 = vector.extract %35[0, 0, 0] : f32 from vector<1x1x1xf32>
      %37 = vector.broadcast %36 : f32 to vector<1x8x128xf32>
      %38 = arith.addf %31, %37 : vector<1x8x128xf32>
      %c0_25 = arith.constant 0 : index
      %c0_26 = arith.constant 0 : index
      %c0_27 = arith.constant 0 : index
      %39 = vector.load %arg5[%c0_25, %c0_26, %c0_27] : memref<1x8x128xf32, #tpu.memory_space<vmem>>, vector<1x8x128xf32>
      tpu.vector_store %arg5[%c0_25, %c0_26, %c0_27], %38 {strides = array<i32>} : memref<1x8x128xf32, #tpu.memory_space<vmem>>, vector<1x8x128xf32>,
    } else {
    }
    return
  }
  func.func @transform_0(%arg0: i32, %arg1: i32, %arg2: i32) -> (i32, i32) {
    %c1_i32 = arith.constant 1 : i32
    %0 = arith.muli %arg0, %c1_i32 : i32
    %1 = arith.addi %0, %arg1 : i32
    %c0_i32 = arith.constant 0 : i32
    return %1, %arg2 : i32, i32
  }
  func.func @transform_1(%arg0: i32, %arg1: i32, %arg2: i32) -> (i32, i32) {
    %c1_i32 = arith.constant 1 : i32
    %0 = arith.muli %arg0, %c1_i32 : i32
    %1 = arith.addi %0, %arg1 : i32
    %c0_i32 = arith.constant 0 : i32
    return %1, %arg2 : i32, i32
  }
  func.func @transform_2(%arg0: i32, %arg1: i32, %arg2: i32) -> (i32, i32, i32) {
    %c0_i32 = arith.constant 0 : i32
    %c0_i32_0 = arith.constant 0 : i32
    %c0_i32_1 = arith.constant 0 : i32
    return %arg0, %c0_i32, %c0_i32_0 : i32, i32, i32
  }
}

</mosaic_0001>

<bundles_post_ra>
// kernel: tpu_custom_call.1
= control target key start
LH: loop header
LB: loop body
LE: loop exit
PB: predicated region body
PF: predicated region fallthrough
CT: control target
= control target key end

     0   :  { %7 = vsyncpa [#allocation6], 0  ;;  %s244_s0 = inlined_call_operand.hbm [shape: f32[8,256], index: 0, kind: input, shape index: {}]   ;;  %s245_s1 = inlined_call_operand.hbm [shape: f32[8,256], index: 1, kind: input, shape index: {}]   ;;  %s246_s2 = inlined_call_operand.hbm [shape: f32[1,8,128], index: 2, kind: output, shape index: {}]  }
   0x1   :  { %8 = vsyncpa [#allocation9], 0 }
   0x2   :  { %9 = vsyncpa [#allocation7], 0  ;;  %s209_s9 = smov [#allocation5]   ;;  %s210_s11 = smov [#allocation8]  }
   0x3   :  { %s20_s10 = sshll.u32 %s209_s9, 4  ;;  %s34_s12 = sshll.u32 %s210_s11, 4  ;;  %s21_s10 = int_to_ptr.vmem [resolvable:$true] %s20_s10  ;;  %s35_s12 = int_to_ptr.vmem [resolvable:$true] %s34_s12 }
   0x4   :  { %s151_s13 = scalar_lea.vmem %s21_s10, 256  ;;  %p156_p1 = scmp.lt.s32.totalorder %s21_s10, %s21_s10 }
   0x5   :  { %p152_p0 = scmp.ne.s32.totalorder %s21_s10, %s151_s13  ;;  %p157_p2 = scmp.lt.s32.totalorder %s151_s13, %s151_s13 }
   0x7   :  { %p158_p3 = por %p157_p2, %p156_p1 }
   0x9   :  { %p159_p4 = pnand %p158_p3, %p152_p0 }
   0xb   :  { %162 = shalt.err (!%p159_p4)
}
   0xc   :  { %23 = dma.hbm_to_vmem [thread:$0]  %s244_s0, 256, %s21_s10, [#allocation6]  }
   0xd   :  { %s171_s16 = scalar_lea.vmem %s35_s12, 256  ;;  %p176_p6 = scmp.lt.s32.totalorder %s35_s12, %s35_s12 }
   0xe   :  { %p172_p5 = scmp.ne.s32.totalorder %s35_s12, %s171_s16  ;;  %p177_p7 = scmp.lt.s32.totalorder %s171_s16, %s171_s16 }
  0x10   :  { %p178_p8 = por %p177_p7, %p176_p6 }
  0x12   :  { %p179_p9 = pnand %p178_p8, %p172_p5 }
  0x14   :  { %182 = shalt.err (!%p179_p9)
}
  0x15   :  { %37 = dma.hbm_to_vmem [thread:$0]  %s245_s1, 256, %s35_s12, [#allocation9]  }
  0x16   :  { %203 = dma.done.wait [#allocation6], 256  }
  0x17   :  { %204 = vsyncadd [#allocation6], 4294967040 }
  0x18   :  { %205 = dma.done.wait [#allocation9], 256  }
  0x19   :  { %206 = vsyncadd [#allocation9], 4294967040  ;;  %vm52_vm0 = vcmask 7168   ;;  %v211_v0 = vmov 0.0   ;;  %v62_v1 = vld [vmem:[#allocation8] sm:$0xff]  ;;  %v63_v2 = vld [vmem:[#allocation8 + $0x8] sm:$0xff] }
  0x1a   :  { %53 = vst.msk [vmem:[#allocation4] sm:$0xff] %vm52_vm0, %v211_v0  ;;  %59 = vst.msk [vmem:[#allocation3] sm:$0xff] %vm52_vm0, %v211_v0  ;;  %v60_v3 = vld [vmem:[#allocation5] sm:$0xff]  ;;  %v76_v4 = vmul.f32 %v62_v1, %v62_v1  ;;  %v77_v5 = vmul.f32 %v63_v2, %v63_v2  ;;  %v61_v6 = vld [vmem:[#allocation5 + $0x8] sm:$0xff]  ;;  %s212_s0 = smov [#allocation10]  }
  0x1b   :  { %58 = vst.msk [vmem:[#allocation2] sm:$0xff] %vm52_vm0, %v211_v0  ;;  %v64_v7 = vsub.f32 %v62_v1, %v60_v3  ;;  %v65_v8 = vsub.f32 %v63_v2, %v61_v6  ;;  %s123_s1 = sshll.u32 %s212_s0, 4  ;;  %s124_s1 = int_to_ptr.vmem [resolvable:$true] %s123_s1 }
  0x1c   :  { %v78_v9 = vadd.f32 %v77_v5, %v76_v4  ;;  %s183_s20 = scalar_lea.vmem %s124_s1, 128  ;;  %p188_p11 = scmp.lt.s32.totalorder %s124_s1, %s124_s1 }
  0x1d   :  { %v67_v10 = vmul.f32 %v64_v7, %v64_v7  ;;  %v68_v11 = vmul.f32 %v65_v8, %v65_v8  ;;  %p184_p10 = scmp.ne.s32.totalorder %s124_s1, %s183_s20  ;;  %p189_p12 = scmp.lt.s32.totalorder %s183_s20, %s183_s20 }
  0x1e   :  { %79 = vadd.xlane.f32.xlu0 %v78_v9 }
  0x1f   :  { %v69_v12 = vadd.f32 %v68_v11, %v67_v10  ;;  %p190_p13 = por %p189_p12, %p188_p11 }
  0x21   :  { %v75_v13 = vld [vmem:[#allocation3] sm:$0xff]  ;;  %v92_v30 = vld [vmem:[#allocation4] sm:$0xff]  ;;  %p191_p0 = pnand %p190_p13, %p184_p10 }
  0x22   :  { %70 = vadd.xlane.f32.xlu0 %v69_v12  ;;  %v66_v16 = vld [vmem:[#allocation2] sm:$0xff] }
  0xa7   :  { %v80_v14 = vpop.xlane.xlu0 %79 }
  0xa8   :  { %v81_v15 = vadd.f32 %v80_v14, %v75_v13 }
  0xaa   :  { %82 = vst.msk [vmem:[#allocation3] sm:$0xff] %vm52_vm0, %v81_v15 }
  0xab   :  { %v71_v17 = vpop.xlane.xlu0 %70 }
  0xac   :  { %v72_v18 = vadd.f32 %v71_v17, %v66_v16 }
  0xae   :  { %74 = vst.msk [vmem:[#allocation2] sm:$0xff] %vm52_vm0, %v72_v18 }
  0xb1   :  { %v87_v19 = vld [vmem:[#allocation3] sm:$0xff] }
  0xb2   :  { %v91_v20 = vadd.f32 1e-08, %v87_v19  ;;  %v88_v22 = vmul.f32 0.001, %v87_v19 }
  0xb4   :  { %139 = vrcp.f32 %v91_v20 }
  0xb5   :  { %v86_v21 = vld [vmem:[#allocation2] sm:$0xff] }
  0xb6   :  { %v89_v23 = vadd.f32 %v88_v22, %v86_v21 }
  0xb8   :  { %v90_v24 = vadd.f32 1e-08, %v89_v23 }
  0xc1   :  { %v140_v25 = vpop.eup %139 }
  0xc2   :  { %v94_v26 = vmul.f32 %v140_v25, %v90_v24 }
  0xc4   :  { %141 = vlog2.f32 %v94_v26 }
  0xd1   :  { %v142_v27 = vpop.eup %141 }
  0xd2   :  { %v96_v28 = vmul.f32 0.6931472, %v142_v27 }
  0xd4   :  { %v97_v29 = vmul.f32 0.4342945, %v96_v28 }
  0xd6   :  { %v98_v31 = vmul.f32 10.0, %v97_v29 }
  0xd8   :  { %v99_v32 = vadd.f32 %v98_v31, %v92_v30 }
  0xda   :  { %100 = vst.msk [vmem:[#allocation4] sm:$0xff] %vm52_vm0, %v99_v32 }
  0xe1   :  { %v103_v33 = vld [vmem:[#allocation4] sm:$0xff] }
  0xe2   :  { %v104_v34 = vsel %vm52_vm0, %v103_v33, 0.0 }
  0xe3   :  { %105 = vadd.xlane.f32.xlu1 %v104_v34 }
 0x16c   :  { %v106_v35 = vpop.xlane.xlu1 %105 }
 0x16d   :  { %v107_v36 = vrot.slane %v106_v35, 4 }
 0x16f   :  { %v108_v37 = vadd.f32 %v107_v36, %v106_v35 }
 0x171   :  { %v109_v38 = vrot.slane %v108_v37, 2 }
 0x173   :  { %v110_v39 = vadd.f32 %v109_v38, %v108_v37 }
 0x175   :  { %v111_v40 = vrot.slane %v110_v39, 1 }
 0x177   :  { %v112_v41 = vadd.f32 %v111_v40, %v110_v39 }
 0x179   :  { %133 = vpush %v112_v41 }
 0x1aa   :  { %s134_s19 = spop %133 }
 0x1ab   :  { %v114_v42 = vstv %s134_s19 }
 0x1ac   :  { %116 = vst [vmem:[#allocation10] sm:$0xff] %v114_v42 }
 0x1ad   :  { %194 = shalt.err (!%p191_p0)
}
 0x1ae   :  { %126 = dma.vmem_to_hbm [thread:$0]  %s124_s1, 128, %s246_s2, [#allocation7]  }
 0x1af   :  { %207 = dma.done.wait [#allocation7], 128  }
 0x1b0   :  { %208 = vsyncadd [#allocation7], 4294967168 }
 0x1b1   :  { %130 = vsyncpa [#allocation6], 1 }
 0x1b2   :  { %131 = vsyncpa [#allocation9], 1 }
 0x1b3   :  { %132 = vsyncpa [#allocation7], 1 }

</bundles_post_ra>
